<compile_context>
chip_gen: v7x
topology: tpu7x:2x2x1
jax: 0.10.0
libtpu: 0.0.40
codegen_flags: <defaults>
</compile_context>

<pallas_src>
import functools

import jax
import jax.numpy as jnp
from jax.experimental import pallas as pl
from jax.experimental.pallas import tpu as pltpu


# --------------------------------------------------------------------------
# Helpers
# --------------------------------------------------------------------------
def _round_up(n, m):
    return ((n + m - 1) // m) * m


def _largest_divisor_leq(n, cap):
    cap = max(1, min(n, int(cap)))
    for d in range(cap, 0, -1):
        if n % d == 0:
            return d
    return 1


def _vmem_budget_bytes():
    """Per-generation VMEM budgeting (v7x has only 64 MiB per TensorCore)."""
    cap = 64 * 1024 * 1024          # conservative default (v7x per-core VMEM)
    try:
        info = pltpu.get_tpu_info()
        cap = int(getattr(info, "vmem_capacity_bytes", cap))
    except Exception:
        pass
    cap = max(16 * 1024 * 1024, min(cap, 128 * 1024 * 1024))
    vmem_limit = (cap * 3) // 4     # scoped-VMEM limit handed to Mosaic
    block_budget = cap // 2         # budget for double-buffered in+out blocks
    return vmem_limit, block_budget


# --------------------------------------------------------------------------
# Kernels
# --------------------------------------------------------------------------
def _se_fused_kernel(inv_s, x_ref, w1t_ref, b1_ref, w2t_ref, b2_ref, o_ref):
    # x_ref: (Bt, C, S_pad).  Zero padding beyond S contributes 0 to the sum,
    # so dividing by the true S gives the exact spatial mean.
    pooled = jnp.sum(x_ref[...], axis=-1) * inv_s                       # (Bt, C)
    h = jnp.dot(pooled, w1t_ref[...],
                preferred_element_type=jnp.float32) + b1_ref[...]       # (Bt, hid)
    h = jnp.maximum(h, 0.0)
    z = jnp.dot(h, w2t_ref[...],
                preferred_element_type=jnp.float32) + b2_ref[...]       # (Bt, C)
    scale = jax.nn.sigmoid(z)
    # Re-read x from the ref for the rescale (short vreg live range).
    o_ref[...] = x_ref[...] * scale[:, :, None]                         # (Bt, C, S_pad)


def _se_pool_fc_kernel(inv_s, x_ref, w1t_ref, b1_ref, w2t_ref, b2_ref, scale_ref):
    # Grid: (S_pad // St,) reduction axis.  scale_ref (B, C) is resident
    # across the axis and doubles as the pooling accumulator.
    s_idx = pl.program_id(0)

    @pl.when(s_idx == 0)
    def _():
        scale_ref[...] = jnp.zeros_like(scale_ref)

    scale_ref[...] += jnp.sum(x_ref[...], axis=-1)                      # (B, C)

    @pl.when(s_idx == pl.num_programs(0) - 1)
    def _():
        pooled = scale_ref[...] * inv_s
        h = jnp.dot(pooled, w1t_ref[...],
                    preferred_element_type=jnp.float32) + b1_ref[...]
        h = jnp.maximum(h, 0.0)
        z = jnp.dot(h, w2t_ref[...],
                    preferred_element_type=jnp.float32) + b2_ref[...]
        scale_ref[...] = jax.nn.sigmoid(z)


def _se_rescale_kernel(x_ref, scale_ref, o_ref):
    # x_ref: (Bt, C, St); scale_ref: (Bt, C, 1) broadcasts over the lane axis.
    o_ref[...] = x_ref[...] * scale_ref[...]


# --------------------------------------------------------------------------
# Wrapper
# --------------------------------------------------------------------------
def se_block(x, w1, b1, w2, b2, *, force_two_pass=False, max_block_bytes=None):
    """x: (B, C, D, H, W) f32. w1: (C//r, C), b1: (C//r,), w2: (C, C//r), b2: (C,)."""
    B, C, D, H, W = x.shape
    S = D * H * W
    hid = w1.shape[0]
    itemsize = 4

    vmem_limit, block_budget = _vmem_budget_bytes()
    if max_block_bytes is not None:
        block_budget = min(block_budget, int(max_block_bytes))

    # Lane-dense spatial axis: pad S up to a multiple of 128.
    S_pad = _round_up(S, 128)
    x_flat = x.reshape(B, C, S).astype(jnp.float32)
    if S_pad != S:
        x_flat = jnp.pad(x_flat, ((0, 0), (0, 0), (0, S_pad - S)))

    # Pre-transpose Linear weights (PyTorch stores them as (out, in)).
    w1t = jnp.asarray(w1, jnp.float32).T            # (C, hid)
    w2t = jnp.asarray(w2, jnp.float32).T            # (hid, C)
    b1_2d = jnp.asarray(b1, jnp.float32).reshape(1, hid)
    b2_2d = jnp.asarray(b2, jnp.float32).reshape(1, C)
    inv_s = 1.0 / float(S)

    # Fused path: needs (in + out) * 2 buffers of (Bt, C, S_pad) f32 in VMEM.
    bt_cap_fused = block_budget // (4 * C * S_pad * itemsize)
    use_fused = (not force_two_pass) and bt_cap_fused >= 1

    if use_fused:
        Bt = _largest_divisor_leq(B, bt_cap_fused)
        out = pl.pallas_call(
            functools.partial(_se_fused_kernel, inv_s),
            out_shape=jax.ShapeDtypeStruct((B, C, S_pad), jnp.float32),
            grid_spec=pltpu.PrefetchScalarGridSpec(
                num_scalar_prefetch=0,
                grid=(B // Bt,),
                in_specs=[
                    pl.BlockSpec((Bt, C, S_pad), lambda b: (b, 0, 0)),  # x
                    pl.BlockSpec((C, hid), lambda b: (0, 0)),           # w1^T
                    pl.BlockSpec((1, hid), lambda b: (0, 0)),           # b1
                    pl.BlockSpec((hid, C), lambda b: (0, 0)),           # w2^T
                    pl.BlockSpec((1, C), lambda b: (0, 0)),             # b2
                ],
                out_specs=pl.BlockSpec((Bt, C, S_pad), lambda b: (b, 0, 0)),
            ),
            compiler_params=pltpu.CompilerParams(
                dimension_semantics=("parallel",),
                vmem_limit_bytes=vmem_limit),
        )(x_flat, w1t, b1_2d, w2t, b2_2d)
    else:
        # ---- Pass 1: pooled sums over S tiles + FCs + sigmoid -> (B, C) ----
        m = S_pad // 128
        st_cap = block_budget // (2 * B * C * 128 * itemsize)
        d1 = _largest_divisor_leq(m, st_cap) if st_cap >= 1 else 1
        St1 = 128 * d1
        scale = pl.pallas_call(
            functools.partial(_se_pool_fc_kernel, inv_s),
            out_shape=jax.ShapeDtypeStruct((B, C), jnp.float32),
            grid_spec=pltpu.PrefetchScalarGridSpec(
                num_scalar_prefetch=0,
                grid=(S_pad // St1,),
                in_specs=[
                    pl.BlockSpec((B, C, St1), lambda s: (0, 0, s)),     # x tile
                    pl.BlockSpec((C, hid), lambda s: (0, 0)),           # w1^T
                    pl.BlockSpec((1, hid), lambda s: (0, 0)),           # b1
                    pl.BlockSpec((hid, C), lambda s: (0, 0)),           # w2^T
                    pl.BlockSpec((1, C), lambda s: (0, 0)),             # b2
                ],
                out_specs=pl.BlockSpec((B, C), lambda s: (0, 0)),
            ),
            compiler_params=pltpu.CompilerParams(
                dimension_semantics=("arbitrary",),
                vmem_limit_bytes=vmem_limit),
        )(x_flat, w1t, b1_2d, w2t, b2_2d)

        scale3 = scale.reshape(B, C, 1)

        # ---- Pass 2: channel-wise rescale, fully parallel (Bt, St) grid ----
        st_cap2 = block_budget // (4 * C * 128 * itemsize)
        d2 = _largest_divisor_leq(m, st_cap2) if st_cap2 >= 1 else 1
        St2 = 128 * d2
        bt_cap2 = block_budget // (4 * C * St2 * itemsize)
        Bt2 = _largest_divisor_leq(B, bt_cap2) if bt_cap2 >= 1 else 1
        out = pl.pallas_call(
            _se_rescale_kernel,
            out_shape=jax.ShapeDtypeStruct((B, C, S_pad), jnp.float32),
            grid_spec=pltpu.PrefetchScalarGridSpec(
                num_scalar_prefetch=0,
                grid=(B // Bt2, S_pad // St2),
                in_specs=[
                    pl.BlockSpec((Bt2, C, St2), lambda b, s: (b, 0, s)),  # x tile
                    pl.BlockSpec((Bt2, C, 1), lambda b, s: (b, 0, 0)),    # scales
                ],
                out_specs=pl.BlockSpec((Bt2, C, St2), lambda b, s: (b, 0, s)),
            ),
            compiler_params=pltpu.CompilerParams(
                dimension_semantics=("parallel", "parallel"),
                vmem_limit_bytes=vmem_limit),
        )(x_flat, scale3)

    if S_pad != S:
        out = out[:, :, :S]
    return out.reshape(B, C, D, H, W)


def se_block_ref(x, w1, b1, w2, b2):
    """Pure-JAX reference of the PyTorch forward."""
    pooled = jnp.mean(x, axis=(2, 3, 4))                    # (B, C)
    h = jnp.maximum(pooled @ w1.T + b1, 0.0)                # (B, C//r)
    w = jax.nn.sigmoid(h @ w2.T + b2)                       # (B, C)
    return x * w[:, :, None, None, None]


if __name__ == "__main__":
    key = jax.random.PRNGKey(0)
    kx, k1, k2, k3, k4, kx2 = jax.random.split(key, 6)

    # Shapes consistent with the module: 5D input, channels=32, reduction=16.
    B, C, D, H, W = 2, 32, 4, 4, 4
    reduction = 16
    hid = C // reduction

    x = jax.random.normal(kx, (B, C, D, H, W), dtype=jnp.float32)
    w1 = jax.random.normal(k1, (hid, C), dtype=jnp.float32) * 0.1
    b1 = jax.random.normal(k2, (hid,), dtype=jnp.float32) * 0.1
    w2 = jax.random.normal(k3, (C, hid), dtype=jnp.float32) * 0.1
    b2 = jax.random.normal(k4, (C,), dtype=jnp.float32) * 0.1

    # 1) Auto-selected (fused single-pass) path.
    out = jax.block_until_ready(se_block(x, w1, b1, w2, b2))
    ref = se_block_ref(x, w1, b1, w2, b2)
    assert out.shape == (B, C, D, H, W)
    assert jnp.allclose(out, ref, atol=1e-5, rtol=1e-5), "fused path mismatch"

    # 2) Exercise the two-pass large-S fallback (tiny forced block budget so
    #    both the S-reduction accumulation and the tiled rescale run).
    x2 = jax.random.normal(kx2, (B, C, 8, 8, 8), dtype=jnp.float32)
    out2 = jax.block_until_ready(
        se_block(x2, w1, b1, w2, b2, force_two_pass=True,
                 max_block_bytes=64 * 1024))
    ref2 = se_block_ref(x2, w1, b1, w2, b2)
    assert jnp.allclose(out2, ref2, atol=1e-5, rtol=1e-5), "two-pass path mismatch"

    print("KERNEL_OK")
</pallas_src>

<mosaic_0001>
module attributes {stable_mosaic.version = 11 : i64} {
  func.func @_se_fused_kernel(%arg0: i32, %arg1: memref<2x32x128xf32, #tpu.memory_space<vmem>>, %arg2: memref<32x2xf32, #tpu.memory_space<vmem>>, %arg3: memref<1x2xf32, #tpu.memory_space<vmem>>, %arg4: memref<2x32xf32, #tpu.memory_space<vmem>>, %arg5: memref<1x32xf32, #tpu.memory_space<vmem>>, %arg6: memref<2x32x128xf32, #tpu.memory_space<vmem>>) attributes {dimension_semantics = [#tpu.dimension_semantics<parallel>], iteration_bounds = array<i64: 1>, scalar_prefetch = 0 : i64, scratch_operands = 0 : i64, tpu.core_type = #tpu.core_type<tc>, window_params = [{transform_indices = @transform_0, window_bounds = array<i64: 2, 32, 128>}, {pipeline_mode = #tpu.pipeline_mode<synchronous>, transform_indices = @transform_1, window_bounds = array<i64: 32, 2>}, {pipeline_mode = #tpu.pipeline_mode<synchronous>, transform_indices = @transform_2, window_bounds = array<i64: 1, 2>}, {pipeline_mode = #tpu.pipeline_mode<synchronous>, transform_indices = @transform_3, window_bounds = array<i64: 2, 32>}, {pipeline_mode = #tpu.pipeline_mode<synchronous>, transform_indices = @transform_4, window_bounds = array<i64: 1, 32>}, {transform_indices = @transform_5, window_bounds = array<i64: 2, 32, 128>}]} {
    %c0 = arith.constant 0 : index
    %c0_0 = arith.constant 0 : index
    %c0_1 = arith.constant 0 : index
    %0 = vector.load %arg1[%c0, %c0_0, %c0_1] : memref<2x32x128xf32, #tpu.memory_space<vmem>>, vector<2x32x128xf32>
    %cst = arith.constant dense<0.000000e+00> : vector<2x32xf32>
    %1 = vector.multi_reduction <add>, %0, %cst [2] : vector<2x32x128xf32> to vector<2x32xf32>
    %cst_2 = arith.constant 1.562500e-02 : f32
    %2 = vector.broadcast %cst_2 : f32 to vector<2x32xf32>
    %3 = arith.mulf %1, %2 : vector<2x32xf32>
    %c0_3 = arith.constant 0 : index
    %c0_4 = arith.constant 0 : index
    %4 = vector.load %arg2[%c0_3, %c0_4] : memref<32x2xf32, #tpu.memory_space<vmem>>, vector<32x2xf32>
    %cst_5 = arith.constant dense<0.000000e+00> : vector<2x2xf32>
    %5 = tpu.matmul %3, %4, %cst_5 {dimension_numbers = #tpu.dot_dimension_numbers<[1], [0], [0], [1], [0, 0, 1, 1], [], []>} : vector<2x32xf32>, vector<32x2xf32>, vector<2x2xf32> -> vector<2x2xf32>
    %c0_6 = arith.constant 0 : index
    %c0_7 = arith.constant 0 : index
    %6 = vector.load %arg3[%c0_6, %c0_7] : memref<1x2xf32, #tpu.memory_space<vmem>>, vector<1x2xf32>
    %7 = vector.broadcast %6 : vector<1x2xf32> to vector<2x2xf32>
    %8 = arith.addf %5, %7 : vector<2x2xf32>
    %cst_8 = arith.constant 0.000000e+00 : f32
    %9 = vector.broadcast %cst_8 : f32 to vector<2x2xf32>
    %10 = arith.maximumf %8, %9 : vector<2x2xf32>
    %c0_9 = arith.constant 0 : index
    %c0_10 = arith.constant 0 : index
    %11 = vector.load %arg4[%c0_9, %c0_10] : memref<2x32xf32, #tpu.memory_space<vmem>>, vector<2x32xf32>
    %cst_11 = arith.constant dense<0.000000e+00> : vector<2x32xf32>
    %12 = tpu.matmul %10, %11, %cst_11 {dimension_numbers = #tpu.dot_dimension_numbers<[1], [0], [0], [1], [0, 0, 1, 1], [], []>} : vector<2x2xf32>, vector<2x32xf32>, vector<2x32xf32> -> vector<2x32xf32>
    %c0_12 = arith.constant 0 : index
    %c0_13 = arith.constant 0 : index
    %13 = vector.load %arg5[%c0_12, %c0_13] : memref<1x32xf32, #tpu.memory_space<vmem>>, vector<1x32xf32>
    %14 = vector.broadcast %13 : vector<1x32xf32> to vector<2x32xf32>
    %15 = arith.addf %12, %14 : vector<2x32xf32>
    %16 = arith.negf %15 : vector<2x32xf32>
    %17 = math.exp %16 : vector<2x32xf32>
    %cst_14 = arith.constant 1.000000e+00 : f32
    %18 = vector.broadcast %cst_14 : f32 to vector<2x32xf32>
    %19 = arith.addf %18, %17 : vector<2x32xf32>
    %20 = arith.divf %18, %19 : vector<2x32xf32>
    %c0_15 = arith.constant 0 : index
    %c0_16 = arith.constant 0 : index
    %c0_17 = arith.constant 0 : index
    %21 = vector.load %arg1[%c0_15, %c0_16, %c0_17] : memref<2x32x128xf32, #tpu.memory_space<vmem>>, vector<2x32x128xf32>
    %22 = vector.shape_cast %20 : vector<2x32xf32> to vector<2x32x1xf32>
    %23 = vector.broadcast %22 : vector<2x32x1xf32> to vector<2x32x128xf32>
    %24 = arith.mulf %21, %23 : vector<2x32x128xf32>
    %c0_18 = arith.constant 0 : index
    %c0_19 = arith.constant 0 : index
    %c0_20 = arith.constant 0 : index
    %25 = vector.load %arg6[%c0_18, %c0_19, %c0_20] : memref<2x32x128xf32, #tpu.memory_space<vmem>>, vector<2x32x128xf32>
    tpu.vector_store %arg6[%c0_18, %c0_19, %c0_20], %24 {strides = array<i32>} : memref<2x32x128xf32, #tpu.memory_space<vmem>>, vector<2x32x128xf32>,
    return
  }
  func.func @transform_0(%arg0: i32) -> (i32, i32, i32) {
    %c0_i32 = arith.constant 0 : i32
    %c0_i32_0 = arith.constant 0 : i32
    %c0_i32_1 = arith.constant 0 : i32
    return %arg0, %c0_i32, %c0_i32_0 : i32, i32, i32
  }
  func.func @transform_1(%arg0: i32) -> (i32, i32) {
    %c0_i32 = arith.constant 0 : i32
    %c0_i32_0 = arith.constant 0 : i32
    %c0_i32_1 = arith.constant 0 : i32
    return %c0_i32, %c0_i32_0 : i32, i32
  }
  func.func @transform_2(%arg0: i32) -> (i32, i32) {
    %c0_i32 = arith.constant 0 : i32
    %c0_i32_0 = arith.constant 0 : i32
    %c0_i32_1 = arith.constant 0 : i32
    return %c0_i32, %c0_i32_0 : i32, i32
  }
  func.func @transform_3(%arg0: i32) -> (i32, i32) {
    %c0_i32 = arith.constant 0 : i32
    %c0_i32_0 = arith.constant 0 : i32
    %c0_i32_1 = arith.constant 0 : i32
    return %c0_i32, %c0_i32_0 : i32, i32
  }
  func.func @transform_4(%arg0: i32) -> (i32, i32) {
    %c0_i32 = arith.constant 0 : i32
    %c0_i32_0 = arith.constant 0 : i32
    %c0_i32_1 = arith.constant 0 : i32
    return %c0_i32, %c0_i32_0 : i32, i32
  }
  func.func @transform_5(%arg0: i32) -> (i32, i32, i32) {
    %c0_i32 = arith.constant 0 : i32
    %c0_i32_0 = arith.constant 0 : i32
    %c0_i32_1 = arith.constant 0 : i32
    return %arg0, %c0_i32, %c0_i32_0 : i32, i32, i32
  }
}

</mosaic_0001>

<bundles_post_ra>
// kernel: tpu_custom_call.1
= control target key start
LH: loop header
LB: loop body
LE: loop exit
PB: predicated region body
PF: predicated region fallthrough
CT: control target
= control target key end

     0   :  { %10 = vsyncpa [#allocation3], 0  ;;  %s595_s0 = inlined_call_operand.hbm [shape: f32[2,32,128], index: 0, kind: input, shape index: {}]   ;;  %s596_s1 = inlined_call_operand.vmem [shape: f32[32,2], index: 1, kind: input, shape index: {}]   ;;  %s597_s2 = inlined_call_operand.vmem [shape: f32[1,2], index: 2, kind: input, shape index: {}]   ;;  %s598_s3 = inlined_call_operand.vmem [shape: f32[2,32], index: 3, kind: input, shape index: {}]   ;;  %s599_s4 = inlined_call_operand.vmem [shape: f32[1,32], index: 4, kind: input, shape index: {}]   ;;  %s600_s5 = inlined_call_operand.hbm [shape: f32[2,32,128], index: 5, kind: output, shape index: {}]  }
   0x1   :  { %11 = vsyncpa [#allocation4], 0  ;;  %s465_s18 = smov [#allocation2]   ;;  %s417_s22 = scalar_lea.hbm %s595_s0, 1024 }
   0x2   :  { %s17_s19 = sshll.u32 %s465_s18, 4  ;;  %p418_p0 = scmp.ne.s32.totalorder %s595_s0, %s417_s22  ;;  %s18_s19 = int_to_ptr.vmem [resolvable:$true] %s17_s19 }
   0x3   :  { %p421_p1 = scmp.lt.u32.totalorder %s417_s22, %s595_s0 }
   0x5   :  { %p423_p2 = pnand %p421_p1, %p418_p0 }
   0x7   :  { %426 = shalt.err (!%p423_p2)
}
   0x8   :  { %s427_s27 = scalar_lea.vmem %s18_s19, 1024  ;;  %p432_p4 = scmp.lt.s32.totalorder %s18_s19, %s18_s19 }
   0x9   :  { %p428_p3 = scmp.ne.s32.totalorder %s18_s19, %s427_s27  ;;  %p433_p5 = scmp.lt.s32.totalorder %s427_s27, %s427_s27 }
   0xb   :  { %p434_p6 = por %p433_p5, %p432_p4 }
   0xd   :  { %p435_p7 = pnand %p434_p6, %p428_p3 }
   0xf   :  { %438 = shalt.err (!%p435_p7)
}
  0x10   :  { %s466_s28 = smov 128   ;;  %s467_s29 = smov 8  }
  0x11   :  { %23 = dma.hbm_to_vmem [thread:$0]  %s595_s0, 1024, %s18_s19, [#allocation3], %s466_s28, %s466_s28, %s467_s29  }
  0x12   :  { %461 = dma.done.wait [#allocation3], 1024  }
  0x13   :  { %462 = vsyncadd [#allocation3], 4294966272  ;;  %v517_v0 = vld [vmem:[#allocation2 + $0x20] sm:$0xff]  ;;  %v523_v2 = vld [vmem:[#allocation2 + $0x28] sm:$0xff]  ;;  %v468_v11 = vmov 0.0|0.0   ;;  %vm469_vm0 = vmmov 0   ;;  %v86_v16 = vlaneseq }
  0x14   :  { %v519_v1 = vld [vmem:[#allocation2] sm:$0xff]  ;;  %51 = vadd.xlane.f32.xlu1 %v517_v0  ;;  %v525_v3 = vld [vmem:[#allocation2 + $0x8] sm:$0xff]  ;;  %v529_v4 = vld [vmem:[#allocation2 + $0x30] sm:$0xff]  ;;  %400 = vmatprep.subr.bf16.mxu0 %v468_v11  ;;  %v470_v15 = vmov 0.0   ;;  %vm97_vm1 = vcmask 130112   ;;  %vm104_vm2 = vcmask 195712  }
  0x15   :  { %43 = vadd.xlane.f32.xlu0 %v519_v1  ;;  %v531_v5 = vld [vmem:[#allocation2 + $0x10] sm:$0xff]  ;;  %v535_v6 = vld [vmem:[#allocation2 + $0x38] sm:$0xff]  ;;  %v67_v8 = vld [vmem:[%s596_s1] sm:$0xff]  ;;  %392 = vmatprep.mubr.msk.f32.mxu0 %vm469_vm0, %v470_v15  ;;  %v87_v19 = vand.u32 127, %v86_v16  ;;  %v553_v21 = vshrl.u32 %v86_v16, 7  ;;  %vm111_vm3 = vcmask 261312  }
  0x16   :  { %v537_v7 = vld [vmem:[#allocation2 + $0x18] sm:$0xff]  ;;  %v68_v9 = vld [vmem:[%s596_s1 + $0x8] sm:$0xff]  ;;  %v69_v12 = vld [vmem:[%s596_s1 + $0x10] sm:$0xff]  ;;  %395 = vmatprep.subr.mxu1 %v470_v15  ;;  %397 = vmatprep.mubr.msk.f32.mxu1 %vm469_vm0, %v470_v15  ;;  %vm132_vm4 = vcmask 1041409   ;;  %vm134_vm5 = vcmask 261120   ;;  %vm220_vm6 = vcmask 1041408  }
  0x17   :  { %v401_v10 = vpack.c.bf16 %v68_v9, %v67_v8  ;;  %v70_v13 = vld [vmem:[%s596_s1 + $0x18] sm:$0xff]  ;;  %v92_v20 = vadd.s32 4294967288, %v87_v19  ;;  %v99_v24 = vadd.s32 4294967280, %v87_v19  ;;  %v106_v28 = vadd.s32 4294967272, %v87_v19  ;;  %v208_v57 = vld [vmem:[%s598_s3] sm:$0x3] }
  0x18   :  { %53 = vadd.xlane.f32.xlu1 %v523_v2  ;;  %v404_v14 = vpack.c.bf16 %v70_v13, %v69_v12  ;;  %v90_v29 = vsub.s32 %v87_v19, %v553_v21  ;;  %396 = vmatpush3.msk.msra.mxu1 %vm220_vm6, %v208_v57  ;;  %v371_v58 = vld [vmem:[%s597_s2] ss:$0 sm:$0xff]  ;;  %vm216_vm7 = vcmask 15360   ;;  %s471_s2 = smov [#allocation5]  }
  0x19   :  { %45 = vadd.xlane.f32.xlu0 %v525_v3  ;;  %402 = vmatpush3.bf16.msra.mxu0 %v401_v10  ;;  %v95_v25 = vsub.s32 %v92_v20, %v553_v21  ;;  %v102_v30 = vsub.s32 %v99_v24, %v553_v21  ;;  %v109_v39 = vsub.s32 %v106_v28, %v553_v21  ;;  %v373_v63 = vld [vmem:[%s599_s4] ss:$0 sm:$0xff]  ;;  %s359_s3 = sshll.u32 %s471_s2, 4  ;;  %s360_s3 = int_to_ptr.vmem [resolvable:$true] %s359_s3 }
  0x1a   :  { %403 = vmatprep.subr.bf16.mxu0 %v468_v11  ;;  %s439_s4 = scalar_lea.vmem %s360_s3, 1024  ;;  %p444_p9 = scmp.lt.s32.totalorder %s360_s3, %s360_s3 }
  0x1b   :  { %p440_p8 = scmp.ne.s32.totalorder %s360_s3, %s439_s4  ;;  %p445_p10 = scmp.lt.s32.totalorder %s439_s4, %s439_s4 }
  0x1c   :  { %55 = vadd.xlane.f32.xlu1 %v529_v4 }
  0x1d   :  { %47 = vadd.xlane.f32.xlu0 %v531_v5  ;;  %405 = vmatpush3.bf16.msra.mxu0 %v404_v14  ;;  %v302_v14 = vsub.s32 0, %v553_v21  ;;  %p446_p11 = por %p445_p10, %p444_p9 }
  0x1f   :  { %p447_p12 = pnand %p446_p11, %p440_p8 }
  0x20   :  { %57 = vadd.xlane.f32.xlu1 %v535_v6 }
  0x21   :  { %49 = vadd.xlane.f32.xlu0 %v537_v7 }
  0xa1   :  { %v52_v17 = vpop.xlane.xlu1 %51 }
  0xa2   :  { %v44_v18 = vpop.xlane.xlu0 %43  ;;  %v63_v33 = vmul.f32 0.015625, %v52_v17  ;;  %v321_v17 = vsub.s32 1, %v553_v21 }
  0xa3   :  { %v59_v34 = vmul.f32 0.015625, %v44_v18 }
  0xa4   :  { %v116_v44 = vrot.slane %v63_v33, %v90_v29 }
  0xa5   :  { %v54_v22 = vpop.xlane.xlu1 %53  ;;  %v91_v45 = vrot.slane %v59_v34, %v90_v29 }
  0xa6   :  { %v46_v23 = vpop.xlane.xlu0 %45  ;;  %v64_v26 = vmul.f32 0.015625, %v54_v22 }
  0xa7   :  { %v60_v27 = vmul.f32 0.015625, %v46_v23 }
  0xa8   :  { %v120_v37 = vrot.slane %v64_v26, %v95_v25 }
  0xa9   :  { %v56_v31 = vpop.xlane.xlu1 %55  ;;  %v96_v38 = vrot.slane %v60_v27, %v95_v25 }
  0xaa   :  { %v48_v32 = vpop.xlane.xlu0 %47  ;;  %v65_v35 = vmul.f32 0.015625, %v56_v31  ;;  %v121_v48 = vsel %vm97_vm1, %v120_v37, %v116_v44 }
  0xab   :  { %v61_v36 = vmul.f32 0.015625, %v48_v32  ;;  %v98_v49 = vsel %vm97_vm1, %v96_v38, %v91_v45 }
  0xac   :  { %v125_v40 = vrot.slane %v65_v35, %v102_v30 }
  0xad   :  { %v103_v41 = vrot.slane %v61_v36, %v102_v30  ;;  %v58_v42 = vpop.xlane.xlu1 %57 }
  0xae   :  { %v50_v43 = vpop.xlane.xlu0 %49  ;;  %v66_v46 = vmul.f32 0.015625, %v58_v42  ;;  %v126_v52 = vsel %vm104_vm2, %v125_v40, %v121_v48 }
  0xaf   :  { %v62_v47 = vmul.f32 0.015625, %v50_v43  ;;  %v105_v53 = vsel %vm104_vm2, %v103_v41, %v98_v49 }
  0xb0   :  { %v130_v50 = vrot.slane %v66_v46, %v109_v39 }
  0xb1   :  { %v110_v51 = vrot.slane %v62_v47, %v109_v39 }
  0xb2   :  { %v131_v55 = vsel %vm111_vm3, %v130_v50, %v126_v52 }
  0xb3   :  { %v112_v54 = vsel %vm111_vm3, %v110_v51, %v105_v53 }
  0xb4   :  { %v133_v56 = vsel %vm132_vm4, %v131_v55, %v112_v54 }
  0xb5   :  { %393 = vmatmul.mubr.msk.f32.vlgmr.msra.gmra.mrb[0].mxu0 %vm134_vm5, %v133_v56 }
 0x188   :  { %v203_v59 = vpop.f32.mrb[0].mxu0 }
 0x189   :  { %v204_v60 = vadd.f32 %v371_v58, %v203_v59  ;;  %v394_v61 = vpop.f32.mrb[1].mxu0 }
 0x18b   :  { %v207_v62 = vmax.f32 %v204_v60, 0.0 }
 0x18d   :  { %398 = vmatmul.mubr.msk.f32.vlgmr.msra.gmra.mrb[0].mxu1 %vm216_vm7, %v207_v62 }
 0x260   :  { %v290_v8 = vpop.f32.mrb[0].mxu1 }
 0x261   :  { %v291_v9 = vadd.f32 %v373_v63, %v290_v8  ;;  %v399_v10 = vpop.f32.mrb[1].mxu1 }
 0x263   :  { %v376_v11 = vmul.f32 -1.442695, %v291_v9 }
 0x265   :  { %413 = vpow2.f32 %v376_v11 }
 0x26f   :  { %v414_v12 = vpop.eup %413 }
 0x270   :  { %v297_v13 = vadd.f32 1.0, %v414_v12 }
 0x272   :  { %415 = vrcp.f32 %v297_v13 }
 0x27c   :  { %v416_v15 = vpop.eup %415 }
 0x27d   :  { %v303_v16 = vrot.slane %v416_v15, %v302_v14  ;;  %v322_v18 = vrot.slane %v416_v15, %v321_v17 }
 0x27f   :  { %309 = vbcast.lane.b32.xlu1 %v303_v16, 264  ;;  %305 = vbcast.lane.b32.xlu0 %v303_v16, 256 }
 0x283   :  { %313 = vbcast.lane.b32.xlu1 %v303_v16, 272  ;;  %324 = vbcast.lane.b32.xlu0 %v322_v18, 256 }
 0x287   :  { %317 = vbcast.lane.b32.xlu1 %v303_v16, 280  ;;  %332 = vbcast.lane.b32.xlu0 %v322_v18, 272 }
 0x28b   :  { %328 = vbcast.lane.b32.xlu1 %v322_v18, 264 }
 0x28f   :  { %336 = vbcast.lane.b32.xlu1 %v322_v18, 280 }
 0x2f1   :  { %v310_v19 = vpop.permute.xlu1 %309  ;;  %v306_v20 = vpop.permute.xlu0 %305 }
 0x2f2   :  { %v339_v22 = vmul.f32 %v310_v19, %v525_v3  ;;  %v338_v23 = vmul.f32 %v306_v20, %v519_v1 }
 0x2f4   :  { %347 = vst [vmem:[#allocation5 + $0x8] sm:$0xff] %v339_v22  ;;  %346 = vst [vmem:[#allocation5] sm:$0xff] %v338_v23 }
 0x2f5   :  { %v314_v24 = vpop.permute.xlu1 %313  ;;  %v325_v25 = vpop.permute.xlu0 %324 }
 0x2f6   :  { %v340_v21 = vmul.f32 %v314_v24, %v531_v5  ;;  %v342_v26 = vmul.f32 %v325_v25, %v517_v0 }
 0x2f8   :  { %348 = vst [vmem:[#allocation5 + $0x10] sm:$0xff] %v340_v21  ;;  %350 = vst [vmem:[#allocation5 + $0x20] sm:$0xff] %v342_v26 }
 0x2f9   :  { %v318_v27 = vpop.permute.xlu1 %317  ;;  %v333_v28 = vpop.permute.xlu0 %332 }
 0x2fa   :  { %v341_v29 = vmul.f32 %v318_v27, %v537_v7  ;;  %v344_v30 = vmul.f32 %v333_v28, %v529_v4 }
 0x2fc   :  { %349 = vst [vmem:[#allocation5 + $0x18] sm:$0xff] %v341_v29  ;;  %352 = vst [vmem:[#allocation5 + $0x30] sm:$0xff] %v344_v30 }
 0x2fd   :  { %v329_v3 = vpop.permute.xlu1 %328 }
 0x2fe   :  { %v343_v1 = vmul.f32 %v329_v3, %v523_v2 }
 0x300   :  { %351 = vst [vmem:[#allocation5 + $0x28] sm:$0xff] %v343_v1 }
 0x301   :  { %v337_v31 = vpop.permute.xlu1 %336 }
 0x302   :  { %v345_v5 = vmul.f32 %v337_v31, %v535_v6 }
 0x304   :  { %353 = vst [vmem:[#allocation5 + $0x38] sm:$0xff] %v345_v5 }
 0x305   :  { %450 = shalt.err (!%p447_p12)
}
 0x306   :  { %s451_s21 = scalar_lea.hbm %s600_s5, 1024 }
 0x307   :  { %p452_p13 = scmp.ne.s32.totalorder %s600_s5, %s451_s21  ;;  %p455_p0 = scmp.lt.u32.totalorder %s451_s21, %s600_s5 }
 0x309   :  { %p457_p1 = pnand %p455_p0, %p452_p13 }
 0x30b   :  { %460 = shalt.err (!%p457_p1)
}
 0x30c   :  { %365 = dma.vmem_to_hbm [thread:$0]  %s360_s3, 1024, %s600_s5, [#allocation4], %s466_s28, %s466_s28, %s467_s29  }
 0x30d   :  { %463 = dma.done.wait [#allocation4], 1024  }
 0x30e   :  { %464 = vsyncadd [#allocation4], 4294966272 }
 0x30f   :  { %369 = vsyncpa [#allocation3], 1 }
 0x310   :  { %370 = vsyncpa [#allocation4], 1 }

</bundles_post_ra>
